<compile_context>
chip_gen: v7x
topology: tpu7x:2x2x1
jax: 0.10.0
libtpu: 0.0.40
codegen_flags: <defaults>
</compile_context>

<pallas_src>
import functools
import math

import jax
import jax.numpy as jnp
from jax import lax
from jax.experimental import pallas as pl
from jax.experimental.pallas import tpu as pltpu


def _round_up(x, m):
    return (x + m - 1) // m * m


def _vmem_capacity_bytes():
    # Generation-aware VMEM capacity (v5e/v6e: 128 MiB, v7x: 64 MiB per TC).
    try:
        return int(pltpu.get_tpu_info().vmem_capacity_bytes)
    except Exception:
        return 64 * 1024 * 1024  # conservative fallback: assume v7x per-TC VMEM


def _choose_blocking(n, tok_cap):
    """Pick token-block size `tok` (multiple of 8) and padded length n_pad.

    Prefers a divisor of round_up(n, 8) so the output needs no trailing [:n]
    slice-copy, and prefers >= 2 grid steps so both v7x TensorCores get work.
    """
    n8 = _round_up(max(n, 1), 8)
    cap = max(8, min((tok_cap // 8) * 8, n8))
    divs = [t for t in range(8, cap + 1, 8) if n8 % t == 0]
    multi = [t for t in divs if n8 // t >= 2]
    tok = max(multi) if multi else (max(divs) if divs else 8)
    if tok * 8 < cap:
        # Divisors of n8 are pathologically small (e.g. 8 * prime): pad up to a
        # multiple of the cap and accept one trailing slice in the wrapper.
        return cap, _round_up(n8, cap)
    return tok, n8


def _embed_onehot_kernel(ids_ref, lut_ref, out_ref, *, scale):
    # ids_ref: (TOK, 1)  int32 token ids for this block (VMEM)
    # lut_ref: (vocab, D) full table, constant block index -> fetched once
    # out_ref: (TOK, D)  lane/sublane-dense output tile
    tok = out_ref.shape[0]
    vocab = lut_ref.shape[0]
    col_ids = lax.broadcasted_iota(jnp.int32, (tok, vocab), 1)
    # Fold sqrt(n_units) into the f32 one-hot: removes a (TOK, D) VPU multiply.
    # (Mosaic's default f32 matmul lowering is multi-pass; accuracy is validated
    #  against the plain-JAX reference at 1e-5 in __main__.)
    one_hot = jnp.where(ids_ref[...] == col_ids,
                        jnp.float32(scale), jnp.float32(0.0))      # (TOK, vocab)
    gathered = jnp.dot(one_hot, lut_ref[...],
                       preferred_element_type=jnp.float32)          # (TOK, D)
    out_ref[...] = gathered.astype(out_ref.dtype)


def _embed_gather_kernel(ids_ref, lut_hbm, out_ref, rows_ref, sem, *, scale, tok):
    # ids_ref : (N_pad,) int32 in SMEM (scalar-prefetched full id array)
    # lut_hbm : (vocab, D) embedding table, left in HBM (memory_space=pl.ANY)
    # out_ref : (TOK, D) output tile
    # rows_ref: (TOK, D) VMEM scratch, DMA-gather destination
    base = pl.program_id(0) * tok

    def fetch(t, carry):
        row = ids_ref[base + t]
        cp = pltpu.make_async_copy(lut_hbm.at[row], rows_ref.at[t], sem)
        cp.start()
        cp.wait()
        return carry

    # TODO(synk): overlap row DMAs with a small in-flight semaphore window and
    # coalesce duplicate/contiguous ids instead of one blocking copy per token.
    lax.fori_loop(0, tok, fetch, 0)
    out_ref[...] = (rows_ref[...].astype(jnp.float32) * scale).astype(out_ref.dtype)


def word_embedding(x, lut, n_units, *, tok_cap=1024, use_gather=None):
    """Pallas equivalent of WordEmbedding.forward: lut[x] * sqrt(n_units)."""
    B, S = x.shape
    vocab, D = lut.shape
    assert D == n_units

    N = B * S
    tok, N_pad = _choose_blocking(N, tok_cap)

    idx_flat = x.reshape(-1).astype(jnp.int32)
    if N_pad != N:
        idx_flat = jnp.pad(idx_flat, (0, N_pad - N))       # pad with token 0

    scale = float(math.sqrt(n_units))
    cap_bytes = _vmem_capacity_bytes()
    itemsize = jnp.dtype(lut.dtype).itemsize
    lut_bytes = vocab * D * itemsize

    # VMEM for the table-resident one-hot path:
    #   table (double-buffered by the default pipeline even though its block
    #   index is constant; TODO(synk): pipeline_mode=pl.Buffered(1) on the lut
    #   spec would halve this) + double-buffered out/ids blocks + f32 temps.
    onehot_vmem = (2 * lut_bytes
                   + 2 * tok * D * itemsize
                   + 2 * tok * 4
                   + tok * vocab * 4 + tok * D * 4)

    if use_gather is None:
        # One-hot MXU gather only pays off for small vocabularies (cutoff is
        # lower still on v5e); otherwise stay on the HBM-roofline DMA gather.
        vocab_cutoff = 1024 if itemsize <= 2 else 512
        use_gather = not (vocab <= vocab_cutoff
                          and onehot_vmem <= 0.45 * cap_bytes)

    grid = (N_pad // tok,)

    if not use_gather:
        assert onehot_vmem <= 0.85 * cap_bytes, (
            "embedding table too large for the VMEM-resident path; "
            "use the DMA-gather path (use_gather=True)")
        ids2d = idx_flat.reshape(N_pad, 1)
        kernel = functools.partial(_embed_onehot_kernel, scale=scale)
        vmem_limit = int(min(0.85 * cap_bytes,
                             max(2 * onehot_vmem, 32 * 1024 * 1024)))
        out_flat = pl.pallas_call(
            kernel,
            out_shape=jax.ShapeDtypeStruct((N_pad, D), lut.dtype),
            grid_spec=pltpu.PrefetchScalarGridSpec(
                num_scalar_prefetch=0,
                grid=grid,
                in_specs=[
                    # Per-block token ids.
                    pl.BlockSpec((tok, 1), lambda i: (i, 0)),
                    # Whole table, same block every step -> loaded once.
                    pl.BlockSpec((vocab, D), lambda i: (0, 0)),
                ],
                out_specs=pl.BlockSpec((tok, D), lambda i: (i, 0)),
            ),
            compiler_params=pltpu.CompilerParams(
                dimension_semantics=("parallel",),
                vmem_limit_bytes=vmem_limit,
            ),
        )(ids2d, lut)
    else:
        # Large-vocab path: table stays in HBM, rows gathered by DMA.
        kernel = functools.partial(_embed_gather_kernel, scale=scale, tok=tok)
        gather_vmem = 3 * tok * D * itemsize
        vmem_limit = int(min(0.85 * cap_bytes,
                             max(2 * gather_vmem, 32 * 1024 * 1024)))
        out_flat = pl.pallas_call(
            kernel,
            out_shape=jax.ShapeDtypeStruct((N_pad, D), lut.dtype),
            grid_spec=pltpu.PrefetchScalarGridSpec(
                num_scalar_prefetch=1,                    # ids -> SMEM
                grid=grid,
                in_specs=[pl.BlockSpec(memory_space=pl.ANY)],   # lut in HBM
                out_specs=pl.BlockSpec((tok, D), lambda i, ids: (i, 0)),
                scratch_shapes=[
                    pltpu.VMEM((tok, D), lut.dtype),
                    pltpu.SemaphoreType.DMA(()),
                ],
            ),
            compiler_params=pltpu.CompilerParams(
                dimension_semantics=("parallel",),
                vmem_limit_bytes=vmem_limit,
            ),
        )(idx_flat, lut)

    if N_pad != N:
        out_flat = out_flat[:N]
    return out_flat.reshape(B, S, D)


if __name__ == "__main__":
    # Small, deterministic setup consistent with the module:
    #   vocab=64, n_units=128, batch=2, seq=8
    vocab, n_units = 64, 128
    B, S = 2, 8

    key = jax.random.PRNGKey(0)
    k_idx, k_lut = jax.random.split(key)

    x = jax.random.randint(k_idx, (B, S), 0, vocab, dtype=jnp.int32)
    # Deterministic "parameter init" for nn.Embedding(vocab, n_units).weight
    lut = jax.random.normal(k_lut, (vocab, n_units), dtype=jnp.float32)

    ref = lut[x] * math.sqrt(n_units)

    # Small-vocab path: VMEM-resident table + one-hot MXU gather.
    out = jax.block_until_ready(word_embedding(x, lut, n_units))
    assert out.shape == (B, S, n_units)
    assert jnp.allclose(out, ref, atol=1e-5, rtol=1e-5)

    # Large-vocab path (forced here to validate): table in HBM, per-row DMA gather.
    out_g = jax.block_until_ready(word_embedding(x, lut, n_units, use_gather=True))
    assert jnp.allclose(out_g, ref, atol=1e-5, rtol=1e-5)

    print("KERNEL_OK")
</pallas_src>

<mosaic_0001>
module attributes {stable_mosaic.version = 11 : i64} {
  func.func @_embed_onehot_kernel(%arg0: i32, %arg1: memref<8x1xi32, #tpu.memory_space<vmem>>, %arg2: memref<64x128xf32, #tpu.memory_space<vmem>>, %arg3: memref<8x128xf32, #tpu.memory_space<vmem>>) attributes {dimension_semantics = [#tpu.dimension_semantics<parallel>], iteration_bounds = array<i64: 2>, scalar_prefetch = 0 : i64, scratch_operands = 0 : i64, tpu.core_type = #tpu.core_type<tc>, window_params = [{transform_indices = @transform_0, window_bounds = array<i64: 8, 1>}, {pipeline_mode = #tpu.pipeline_mode<synchronous>, transform_indices = @transform_1, window_bounds = array<i64: 64, 128>}, {transform_indices = @transform_2, window_bounds = array<i64: 8, 128>}]} {
    %0 = tpu.iota {dimensions = array<i32: 1>} : vector<8x64xi32>
    %c0 = arith.constant 0 : index
    %c0_0 = arith.constant 0 : index
    %1 = vector.load %arg1[%c0, %c0_0] : memref<8x1xi32, #tpu.memory_space<vmem>>, vector<8x1xi32>
    %2 = vector.broadcast %1 : vector<8x1xi32> to vector<8x64xi32>
    %3 = arith.cmpi eq, %2, %0 : vector<8x64xi32>
    %cst = arith.constant 11.3137083 : f32
    %cst_1 = arith.constant 0.000000e+00 : f32
    %4 = vector.broadcast %cst : f32 to vector<8x64xf32>
    %5 = vector.broadcast %cst_1 : f32 to vector<8x64xf32>
    %6 = arith.select %3, %4, %5 : vector<8x64xi1>, vector<8x64xf32>
    %c0_2 = arith.constant 0 : index
    %c0_3 = arith.constant 0 : index
    %7 = vector.load %arg2[%c0_2, %c0_3] : memref<64x128xf32, #tpu.memory_space<vmem>>, vector<64x128xf32>
    %cst_4 = arith.constant dense<0.000000e+00> : vector<8x128xf32>
    %8 = tpu.matmul %6, %7, %cst_4 {dimension_numbers = #tpu.dot_dimension_numbers<[1], [0], [0], [1], [0, 0, 1, 1], [], []>} : vector<8x64xf32>, vector<64x128xf32>, vector<8x128xf32> -> vector<8x128xf32>
    %c0_5 = arith.constant 0 : index
    %c0_6 = arith.constant 0 : index
    %9 = vector.load %arg3[%c0_5, %c0_6] : memref<8x128xf32, #tpu.memory_space<vmem>>, vector<8x128xf32>
    tpu.vector_store %arg3[%c0_5, %c0_6], %8 {strides = array<i32>} : memref<8x128xf32, #tpu.memory_space<vmem>>, vector<8x128xf32>,
    return
  }
  func.func @transform_0(%arg0: i32) -> (i32, i32) {
    %c0_i32 = arith.constant 0 : i32
    %c0_i32_0 = arith.constant 0 : i32
    return %arg0, %c0_i32 : i32, i32
  }
  func.func @transform_1(%arg0: i32) -> (i32, i32) {
    %c0_i32 = arith.constant 0 : i32
    %c0_i32_0 = arith.constant 0 : i32
    %c0_i32_1 = arith.constant 0 : i32
    return %c0_i32, %c0_i32_0 : i32, i32
  }
  func.func @transform_2(%arg0: i32) -> (i32, i32) {
    %c0_i32 = arith.constant 0 : i32
    %c0_i32_0 = arith.constant 0 : i32
    return %arg0, %c0_i32 : i32, i32
  }
}

</mosaic_0001>

<bundles_post_ra>
// kernel: tpu_custom_call.1
= control target key start
LH: loop header
LB: loop body
LE: loop exit
PB: predicated region body
PF: predicated region fallthrough
CT: control target
= control target key end

     0   :  { %7 = vsyncpa [#allocation3], 0  ;;  %s694_s0 = inlined_call_operand.vmem [shape: s32[16,1], index: 0, kind: input, shape index: {}]   ;;  %s695_s1 = inlined_call_operand.hbm [shape: f32[64,128], index: 1, kind: input, shape index: {}]   ;;  %s696_s2 = inlined_call_operand.hbm [shape: f32[16,128], index: 2, kind: output, shape index: {}]  }
   0x1   :  { %8 = vsyncpa [#allocation4], 0 }
   0x2   :  { %10 = vsyncpa [#allocation4 + $0x1], 0  ;;  %s559_s9 = smov 0   ;;  %s561_s10 = smov 0  }
   0x3   :  { %s563_s11 = smov 0   ;;  %s565_s12 = smov 0  }
   0x4 LB: > { %s580_s13 = sadd.s32 4294967295, %s534_s12   ;;  %s330_s14 = sadd.s32 4294967294, %s534_s12   ;;  %s534_s12 = sphi %s565_s12, %s712_s12   ;;  %s530_s11 = sphi %s563_s11, %s711_s11   ;;  %s526_s10 = sphi %s561_s10, %s710_s10   ;;  %s522_s9 = sphi %s559_s9, %s709_s9  }
   0x5   : > { %s584_s15 = sadd.s32 1, %s534_s12   ;;  %s70_s16 = sadd.s32 1, %s530_s11 }
   0x6   : > { %s67_s17 = ssub.s32 %s534_s12, %s584_s15  ;;  %p80_p0 = scmp.ne.s32.totalorder %s530_s11, %s526_s10 }
   0x7   : > { %p68_p1 = scmp.eq.s32.totalorder %s67_s17, 0  ;;  %p81_p2 = scmp.eq.s32.totalorder %s580_s13, 1 }
   0x8   : > { %p86_p3 = scmp.ne.s32.totalorder %s526_s10, %s522_s9  ;;  %p87_p4 = scmp.eq.s32.totalorder %s330_s14, 1 }
   0x9   : > { %s595_s18 = scalar_select %p68_p1, %s530_s11, %s70_s16  }
   0xa   : > { %p597_p5 = por %p81_p2, %p80_p0  ;;  %p601_p6 = por %p87_p4, %p86_p3 }
   0xb   : > { %p331_p7 = scmp.ge.s32.totalorder %s534_s12, 1  ;;  %p94_p8 = scmp.lt.s32.totalorder %s534_s12, 3 }
   0xc   : > { %s700_s19 = scalar_select %p597_p5, 1, 0 }
   0xd   : > { %s701_s20 = scalar_select %p601_p6, 1, 0 }
   0xe   : > { %p697_p9 = scmp.eq.s32.totalorder %s580_s13, 0  ;;  %p608_p10 = pnand %p331_p7, %p94_p8 }
   0xf   : > { %s536_s22 = smov [#allocation2]   ;;  %s440_s27 = scalar_lea.hbm %s695_s1, 1024 }
  0x10   : > { %s702_s21 = scalar_select %p608_p10, 1, 0 }
  0x11   : > { %s106_s23 = sshll.u32 %s536_s22, 4  ;;  %p389_p11 = pneg %p608_p10  ;;  %s107_s23 = int_to_ptr.vmem [resolvable:$true] %s106_s23 }
  0x12   : > { %p441_p13 = scmp.ne.s32.totalorder %s695_s1, %s440_s27  ;;  %p447_p3 = scmp.lt.u32.totalorder %s440_s27, %s695_s1 }
  0x13   : > { %p616_p12 = pnand %p697_p9, %p389_p11 }
  0x15   : > { %p442_p0 = pneg %p616_p12 }
  0x17   : > { %p443_p1 = pnand %p442_p0, %p441_p13 }
  0x19   : > { %p444_p2 = pneg %p443_p1 }
  0x1b   : > { %p449_p4 = pnand %p447_p3, %p444_p2 }
  0x1d   : > { %452 = shalt.err (!%p449_p4)
}
  0x1e   : > { %s453_s4 = scalar_lea.vmem %s107_s23, 1024  ;;  %p461_p9 = scmp.lt.s32.totalorder %s107_s23, %s107_s23 }
  0x1f   : > { %p454_p7 = scmp.ne.s32.totalorder %s107_s23, %s453_s4  ;;  %p462_p6 = scmp.lt.s32.totalorder %s453_s4, %s453_s4 }
  0x21   : > { %p456_p8 = pnand %p454_p7, %p442_p0  ;;  %p463_p5 = por %p462_p6, %p461_p9 }
  0x23   : > { %p457_p11 = pneg %p456_p8 }
  0x25   : > { %p464_p10 = pnand %p463_p5, %p457_p11 }
  0x27   : > { %467 = shalt.err (!%p464_p10)
}
  0x28   : > { %s537_s5 = smov 128   ;;  %s538_s6 = smov 8  }
  0x29   : > { %392 = dma.hbm_to_vmem [thread:$0]  (!%p616_p12), %s695_s1, 1024, %s107_s23, [#allocation3], %s537_s5, %s537_s5, %s538_s6  }
  0x2a   : > { %p704_p13 = scmp.ne.s32.totalorder %s702_s21, 0 }
  0x2b   : > { %p705_p1 = scmp.eq.s32.totalorder (!%p704_p13), %s580_s13, 0 }
  0x2c   : > { %129 = sbr.rel (%p704_p13) target bundleno = 415 (0x19f), region = 28 }
  0x33   : > { %513 = dma.done.wait (%p705_p1), [#allocation3], 1024   ;;  %p706_p0 = pmov %p705_p1 }
  0x34   : > { %p150_p5 = scmp.lt.s32.totalorder %s580_s13, 1  ;;  %v539_v0 = vmov 0   ;;  %v540_v1 = vmov 0.0|0.0   ;;  %v162_v3 = vld [vmem:[#allocation2] sm:$0xff]  ;;  %v163_v4 = vld [vmem:[#allocation2 + $0x8] sm:$0xff]  ;;  %v164_v6 = vld [vmem:[#allocation2 + $0x10] sm:$0xff]  ;;  %v154_v16 = vlaneseq }
  0x35   : > { %515 = vsyncadd (%p706_p0), [#allocation3], 4294966272  ;;  %439 = vset.pattern.permute.xlu0 %v539_v0  ;;  %371 = vmatprep.subr.bf16.mxu0 %v540_v1  ;;  %v372_v5 = vpack.c.bf16 %v163_v4, %v162_v3  ;;  %v165_v7 = vld [vmem:[#allocation2 + $0x18] sm:$0xff]  ;;  %vm541_vm0 = vmmov 0   ;;  %v542_v8 = vmov 0.0   ;;  %v166_v10 = vld [vmem:[#allocation2 + $0x20] sm:$0xff] }
  0x36   : > { %s151_s14 = scalar_select %p150_p5, %s580_s13, 1  ;;  %368 = vmatprep.mubr.msk.f32.mxu0 %vm541_vm0, %v542_v8  ;;  %v375_v9 = vpack.c.bf16 %v165_v7, %v164_v6  ;;  %v167_v11 = vld [vmem:[#allocation2 + $0x28] sm:$0xff]  ;;  %v168_v13 = vld [vmem:[#allocation2 + $0x30] sm:$0xff]  ;;  %v169_v14 = vld [vmem:[#allocation2 + $0x38] sm:$0xff]  ;;  %v155_v17 = vand.u32 127, %v154_v16  ;;  %vm170_vm1 = vcmask 523264  }
  0x37   : > { %373 = vmatpush3.bf16.msra.mxu0 %v372_v5  ;;  %v378_v12 = vpack.c.bf16 %v167_v11, %v166_v10  ;;  %v381_v15 = vpack.c.bf16 %v169_v14, %v168_v13  ;;  %s147_s23 = sand.u32 1, %s526_s10   ;;  %s340_s27 = sshll.u32 %s580_s13, 7 }
  0x38   : > { %s337_s16 = sshll.u32 %s151_s14, 3  ;;  %374 = vmatprep.subr.bf16.mxu0 %v540_v1  ;;  %s336_s24 = sshll.u32 %s147_s23, 3 }
  0x39   : > { %s153_s21 = scalar_lea.vmem %s694_s0, %s337_s16  ;;  %s149_s25 = scalar_lea.vmem [#allocation5], %s336_s24 }
  0x3a   : > { %v156_v2 = vld [vmem:[%s153_s21] sm:$0xff]  ;;  %s259_s26 = sshll.u32 %s149_s25, 4  ;;  %s654_s30 = scalar_lea.hbm %s696_s2, %s340_s27  ;;  %s649_s26 = int_to_ptr.vmem [resolvable:$true] %s259_s26 }
  0x3b   : > { %158 = vperm.xlu0 %439, %v156_v2   ;;  %376 = vmatpush3.bf16.msra.mxu0 %v375_v9  ;;  %s246_s3 = scalar_lea.sflag [#allocation4], %s147_s23  ;;  %s468_s4 = scalar_lea.vmem %s649_s26, 128 }
  0x3c   : > { %377 = vmatprep.subr.bf16.mxu0 %v540_v1  ;;  %p469_p6 = scmp.ne.s32.totalorder %s649_s26, %s468_s4  ;;  %p707_p9 = scmp.ne.s32.totalorder %s700_s19, 0 }
  0x3d   : > { %s543_s13 = smov [#allocation5]  }
  0x3e   : > { %p470_p10 = pnand %p469_p6, %p707_p9  ;;  %s472_s5 = sshll.u32 %s543_s13, 4  ;;  %s473_s5 = int_to_ptr.vmem [resolvable:$false] %s472_s5 }
  0x3f   : > { %379 = vmatpush3.bf16.msra.mxu0 %v378_v12  ;;  %s474_s6 = scalar_lea.vmem %s473_s5, 256  ;;  %p475_p2 = scmp.lt.s32.totalorder %s649_s26, %s473_s5 }
  0x40   : > { %380 = vmatprep.subr.bf16.mxu0 %v540_v1  ;;  %p471_p12 = pneg %p470_p10  ;;  %p476_p3 = scmp.lt.s32.totalorder %s474_s6, %s468_s4 }
  0x42   : > { %p477_p4 = por %p476_p3, %p475_p2 }
  0x43   : > { %382 = vmatpush3.bf16.msra.mxu0 %v381_v15 }
  0x44   : > { %p478_p7 = pnand %p477_p4, %p471_p12 }
  0xba   : > { %v159_v18 = vpop.permute.xlu0 %158 }
  0xbb   : > { %vm160_vm2 = vcmp.eq.s32.totalorder %v159_v18, %v155_v17 }
  0xbc   : > { %v161_v19 = vsel %vm160_vm2, 11.313708, %v542_v8 }
  0xbd   : > { %369 = vmatmul.mubr.msk.f32.vlgmr.msra.gmra.mrb[0].mxu0 %vm170_vm1, %v161_v19 }
 0x190   : > { %v240_v20 = vpop.f32.mrb[0].mxu0 }
 0x191   : > { %244 = vst [vmem:[%s149_s25] sm:$0xff] %v240_v20  ;;  %v370_v21 = vpop.f32.mrb[1].mxu0 }
 0x192   : > { %481 = shalt.err (!%p478_p7)
}
 0x193   : > { %s482_s7 = scalar_lea.hbm %s654_s30, 128  ;;  %s486_s16 = scalar_lea.hbm %s696_s2, 256 }
 0x194   : > { %p483_p8 = scmp.ne.s32.totalorder %s654_s30, %s482_s7  ;;  %p487_p1 = scmp.lt.u32.totalorder %s654_s30, %s696_s2 }
 0x195   : > { %p488_p0 = scmp.lt.u32.totalorder %s486_s16, %s482_s7  ;;  %p490_p6 = scmp.lt.u32.totalorder %s482_s7, %s654_s30 }
 0x196   : > { %p484_p11 = pnand %p483_p8, %p707_p9 }
 0x197   : > { %p489_p5 = por %p488_p0, %p487_p1 }
 0x198   : > { %p485_p13 = pneg %p484_p11 }
 0x199   : > { %p491_p10 = por %p490_p6, %p489_p5 }
 0x19b   : > { %p492_p12 = pnand %p491_p10, %p485_p13 }
 0x19d   : > { %495 = shalt.err (!%p492_p12)
}
 0x19e   : > { %387 = dma.vmem_to_hbm [thread:$0]  (%p707_p9), %s649_s26, 128, %s654_s30, %s246_s3  }
 0x19f PF: > { %p399_p2 = scmp.ge.s32.totalorder %s534_s12, 2  ;;  %s271_s21 = sand.u32 1, %s522_s9  }
 0x1a0   : > { %p708_p3 = scmp.ne.s32.totalorder %s701_s20, 0  ;;  %s272_s23 = scalar_lea.sflag [#allocation4], %s271_s21 }
 0x1a2   : > { %p394_p4 = pnand %p399_p2, %p708_p3 }
 0x1a4   : > { %517 = dma.done.wait (!%p394_p4), %s272_s23, 128  }
 0x1a5   : > { %519 = vsyncadd (!%p394_p4), %s272_s23, 4294967168  ;;  %p13_p7 = scmp.ge.s32.totalorder %s584_s15, 4   ;;  %s709_s9 = smov %s526_s10 }
 0x1a6   : > { %s710_s10 = smov %s530_s11  ;;  %s711_s11 = smov %s595_s18 }
 0x1a7   : > { %s712_s12 = smov %s584_s15  ;;  %15 = sbr.rel (!%p13_p7) target bundleno = 4 (0x4), region = 68 }
 0x1ae   :  { %277 = vsyncpa [#allocation3], 1 }
 0x1af   :  { %279 = vsyncpa [#allocation3 + $0x1], 1 }
 0x1b0   :  { %280 = vsyncpa [#allocation4], 1 }
 0x1b1   :  { %282 = vsyncpa [#allocation4 + $0x1], 1 }

</bundles_post_ra>
